<compile_context>
chip_gen: v5e
topology: v5e:2x2
jax: 0.10.0
libtpu: 0.0.40
codegen_flags: <defaults>
</compile_context>

<pallas_src>
import functools

import jax
import jax.numpy as jnp
from jax.experimental import pallas as pl
from jax.experimental.pallas import tpu as pltpu

_LANE = 128      # vreg lane width (last dim)
_SUBLANE = 8     # vreg sublane width (second-to-last dim)

# Per-input-buffer VMEM target (padded bytes).  >=512-wide tiles already hit
# ~85% of HBM roofline, so 4 MiB leaves ample margin for double buffering and
# f32 temporaries under the 32 MiB scoped limit on every generation.
_TARGET_TILE_BYTES = 4 * 1024 * 1024
_VMEM_LIMIT_BYTES = 32 * 1024 * 1024

# Inputs at/below this size use the fused-XLA fallback.
_XLA_FALLBACK_BYTES = 64 * 1024


def _round_up(value, multiple):
    return (value + multiple - 1) // multiple * multiple


# ---------------------------------------------------------------------------
# Kernels
# ---------------------------------------------------------------------------

def _l2_row_tile_kernel(x_ref, o_ref, *, true_rows, tile_rows, groups,
                        n_shapelets, row_ragged):
    """1-D grid over row tiles: partial sum of per-row L2 norms.

    groups == 1 : rows are original (batch, n_shapelets) rows.
    groups  > 1 : lane-dense path; the wrapper reshaped the input to
                  (B*N/128, 128) so every VMEM row holds `groups` original
                  rows, recovered with a segmented MXU reduce.
    """
    i = pl.program_id(0)

    x = x_ref[...].astype(jnp.float32)
    # torch.clamp(1e-8) == lower clamp only (NaN propagates identically).
    x = jnp.maximum(x, jnp.float32(1e-8))
    sq = x * x

    if groups == 1:
        ssq = jnp.sum(sq, axis=1, keepdims=True)                  # (tile_rows, 1)
    else:
        # Static (128, groups) block-diagonal ones: seg[l, g] = (l // N == g).
        lane = jax.lax.broadcasted_iota(jnp.int32, (_LANE, groups), 0)
        grp = jax.lax.broadcasted_iota(jnp.int32, (_LANE, groups), 1)
        seg = (lane // n_shapelets == grp).astype(jnp.float32)
        # Segmented reduce on the otherwise-idle MXU; HIGHEST keeps f32
        # accuracy (default precision would round sq to bf16).
        ssq = jnp.dot(sq, seg, preferred_element_type=jnp.float32,
                      precision=jax.lax.Precision.HIGHEST)        # (tile_rows, groups)

    norms = jnp.sqrt(ssq)

    if row_ragged:
        # Tail rows of the last tile are Pallas block padding (possibly
        # NaN/Inf garbage).  Mask AFTER the row reduce with a select (never
        # `norms * mask`) so garbage can never poison the partial sum.
        row = jax.lax.broadcasted_iota(jnp.int32, norms.shape, 0) + i * tile_rows
        norms = jnp.where(row < true_rows, norms, jnp.float32(0.0))

    o_ref[0, 0] = jnp.sum(norms)


def _l2_rows_cols_kernel(x_ref, o_ref, ssq_ref, *, true_b, true_n, tile_b,
                         tile_n, row_ragged, col_ragged):
    """2-D grid (rows "parallel", cols "arbitrary") for very wide N.

    Accumulates per-row sum-of-squares across column tiles in a small VMEM
    scratch; sqrt / tail-row masking / partial-sum emission happen on the
    last column step only.
    """
    i = pl.program_id(0)
    k = pl.program_id(1)
    nk = pl.num_programs(1)

    @pl.when(k == 0)
    def _():
        ssq_ref[...] = jnp.zeros_like(ssq_ref)

    x = x_ref[...].astype(jnp.float32)
    x = jnp.maximum(x, jnp.float32(1e-8))
    if col_ragged:
        # Tail columns of the last column tile are block padding; select them
        # to 0 *after* the clamp so they contribute exactly nothing.
        col = jax.lax.broadcasted_iota(jnp.int32, x.shape, 1) + k * tile_n
        x = jnp.where(col < true_n, x, jnp.float32(0.0))
    ssq_ref[...] += jnp.sum(x * x, axis=1, keepdims=True)

    @pl.when(k == nk - 1)
    def _():
        norms = jnp.sqrt(ssq_ref[...])                            # (tile_b, 1)
        if row_ragged:
            row = jax.lax.broadcasted_iota(jnp.int32, norms.shape, 0) + i * tile_b
            norms = jnp.where(row < true_b, norms, jnp.float32(0.0))
        o_ref[0, 0] = jnp.sum(norms)


# ---------------------------------------------------------------------------
# Launchers
# ---------------------------------------------------------------------------

def _pick_row_tile(total_rows, padded_row_bytes):
    """Largest sublane-aligned row tile under the byte budget; >=2 tiles when possible."""
    rows = max(_SUBLANE,
               (_TARGET_TILE_BYTES // max(1, padded_row_bytes)) // _SUBLANE * _SUBLANE)
    if total_rows > _SUBLANE:
        # Keep at least two row tiles so the "parallel" axis can shard across
        # both v7x TensorCores.
        rows = min(rows, _round_up(pl.cdiv(total_rows, 2), _SUBLANE))
    if rows >= total_rows:
        return total_rows          # single full-extent block (exempt from 8-rule)
    return rows


def _normalize_row_tile(tile_rows, total_rows):
    if tile_rows >= total_rows:
        return total_rows
    tile = max(_SUBLANE, (tile_rows // _SUBLANE) * _SUBLANE)
    return min(tile, total_rows)


def _row_tiled_norm_sum(x2d, *, groups, n_shapelets, tile_rows=None):
    """Sum of per-(original-)row L2 norms via the 1-D row-tiled kernel."""
    rows, cols = x2d.shape
    itemsize = x2d.dtype.itemsize
    padded_row_bytes = _round_up(cols, _LANE) * itemsize   # real (padded) VMEM footprint
    if tile_rows is None:
        tile = _pick_row_tile(rows, padded_row_bytes)
    else:
        tile = _normalize_row_tile(tile_rows, rows)
    num_tiles = pl.cdiv(rows, tile)

    kernel = functools.partial(
        _l2_row_tile_kernel, true_rows=rows, tile_rows=tile, groups=groups,
        n_shapelets=n_shapelets, row_ragged=(rows % tile != 0))

    partials = pl.pallas_call(
        kernel,
        out_shape=jax.ShapeDtypeStruct((num_tiles, 1), jnp.float32),
        grid=(num_tiles,),
        in_specs=[pl.BlockSpec((tile, cols), lambda i: (i, 0))],
        out_specs=pl.BlockSpec((1, 1), lambda i: (i, 0),
                               memory_space=pltpu.MemorySpace.SMEM),
        compiler_params=pltpu.CompilerParams(
            dimension_semantics=("parallel",),
            vmem_limit_bytes=_VMEM_LIMIT_BYTES),
    )(x2d)
    return jnp.sum(partials)


def _cols_tiled_norm_sum(x, *, tile_rows=None, tile_cols=None):
    """Sum of per-row L2 norms for very wide N: 2-D grid with a column reduction."""
    batch, n = x.shape
    itemsize = x.dtype.itemsize

    if tile_cols is None:
        tile_n = max(_LANE,
                     (_TARGET_TILE_BYTES // (_SUBLANE * itemsize)) // _LANE * _LANE)
    else:
        tile_n = max(_LANE, (tile_cols // _LANE) * _LANE)
    if tile_n >= n:
        tile_n = n

    if tile_rows is None:
        tile_b = batch if batch <= _SUBLANE else _SUBLANE
    else:
        tile_b = _normalize_row_tile(tile_rows, batch)

    num_row_tiles = pl.cdiv(batch, tile_b)
    num_col_tiles = pl.cdiv(n, tile_n)

    kernel = functools.partial(
        _l2_rows_cols_kernel, true_b=batch, true_n=n, tile_b=tile_b,
        tile_n=tile_n, row_ragged=(batch % tile_b != 0),
        col_ragged=(n % tile_n != 0))

    partials = pl.pallas_call(
        kernel,
        out_shape=jax.ShapeDtypeStruct((num_row_tiles, 1), jnp.float32),
        grid=(num_row_tiles, num_col_tiles),             # reduction axis last
        in_specs=[pl.BlockSpec((tile_b, tile_n), lambda i, k: (i, k))],
        out_specs=pl.BlockSpec((1, 1), lambda i, k: (i, 0),
                               memory_space=pltpu.MemorySpace.SMEM),
        scratch_shapes=[pltpu.VMEM((tile_b, 1), jnp.float32)],
        compiler_params=pltpu.CompilerParams(
            dimension_semantics=("parallel", "arbitrary"),
            vmem_limit_bytes=_VMEM_LIMIT_BYTES),
    )(x)
    return jnp.sum(partials)


# ---------------------------------------------------------------------------
# Public wrapper
# ---------------------------------------------------------------------------

def l2_distance_loss(x, *, tile_rows=None, tile_cols=None, force_pallas=False):
    """x: (batch_size, n_shapelets) -> scalar float32 loss (mean row L2 norm)."""
    assert x.ndim == 2, "expected (batch_size, n_shapelets)"
    batch, n = x.shape
    itemsize = x.dtype.itemsize

    # Tiny inputs: kernel launch / per-step overhead dominates; fused XLA wins.
    if not force_pallas and batch * n * itemsize <= _XLA_FALLBACK_BYTES:
        xc = jnp.maximum(x.astype(jnp.float32), jnp.float32(1e-8))
        return jnp.mean(jnp.sqrt(jnp.sum(xc * xc, axis=1)))

    padded_n = _round_up(n, _LANE)
    wide_n = (tile_cols is not None and tile_cols < n) or (
        _SUBLANE * padded_n * itemsize > _TARGET_TILE_BYTES)

    if wide_n:
        total = _cols_tiled_norm_sum(x, tile_rows=tile_rows, tile_cols=tile_cols)
    elif n < _LANE and _LANE % n == 0 and (batch * n) % _LANE == 0:
        # Lane-dense narrow-N path: free row-major reshape to full 128-lane rows.
        groups = _LANE // n
        total = _row_tiled_norm_sum(
            x.reshape((batch * n) // _LANE, _LANE),
            groups=groups, n_shapelets=n, tile_rows=tile_rows)
    else:
        total = _row_tiled_norm_sum(x, groups=1, n_shapelets=n,
                                    tile_rows=tile_rows)

    return total / jnp.float32(batch)


def l2_distance_loss_ref(x):
    """Pure-JAX reference mirroring the PyTorch module."""
    xc = jnp.maximum(x.astype(jnp.float32), 1e-8)
    return jnp.mean(jnp.linalg.norm(xc, axis=1))


if __name__ == "__main__":
    key = jax.random.PRNGKey(0)
    k1, k2, k3, k4, k5 = jax.random.split(key, 5)

    # 1) Natural module scale (batch=2, n_shapelets=32): XLA fallback + forced
    #    Pallas single-block path (64 elems/row -> general path, full block).
    x_small = jax.random.uniform(k1, (2, 32), jnp.float32, minval=-0.1, maxval=1.0)
    out_fallback = l2_distance_loss(x_small)
    out_small = l2_distance_loss(x_small, force_pallas=True)
    ref_small = l2_distance_loss_ref(x_small)

    # 2) Lane-dense narrow-N path (N=32 -> 4 original rows per 128-lane row),
    #    forced small tiles to exercise the ragged row-tile tail + MXU reduce.
    x_dense = jax.random.uniform(k2, (320, 32), jnp.float32, minval=-0.1, maxval=1.0)
    out_dense = l2_distance_loss(x_dense, tile_rows=24, force_pallas=True)
    ref_dense = l2_distance_loss_ref(x_dense)

    # 3) General row-tiled path (N=48 does not divide 128) with a ragged tail.
    x_gen = jax.random.uniform(k3, (300, 48), jnp.float32, minval=-0.1, maxval=1.0)
    out_gen = l2_distance_loss(x_gen, tile_rows=128, force_pallas=True)
    ref_gen = l2_distance_loss_ref(x_gen)

    # 4) Wide-N column-accumulation path (forced via tile_cols): ragged rows
    #    AND ragged cols, exercising the VMEM scratch + pl.when init/finalize.
    x_wide = jax.random.uniform(k4, (40, 320), jnp.float32, minval=-0.1, maxval=1.0)
    out_wide = l2_distance_loss(x_wide, tile_rows=16, tile_cols=128,
                                force_pallas=True)
    ref_wide = l2_distance_loss_ref(x_wide)

    # 5) bf16 input through the lane-dense path (half the HBM bytes streamed;
    #    math still done in f32 in-kernel).
    x_bf16 = jax.random.uniform(k5, (256, 64), minval=0.0, maxval=1.0).astype(
        jnp.bfloat16)
    out_bf16 = l2_distance_loss(x_bf16, force_pallas=True)
    ref_bf16 = l2_distance_loss_ref(x_bf16)

    jax.block_until_ready(
        (out_fallback, out_small, out_dense, out_gen, out_wide, out_bf16))

    assert jnp.allclose(out_fallback, ref_small, rtol=1e-5, atol=1e-6), (
        out_fallback, ref_small)
    assert jnp.allclose(out_small, ref_small, rtol=1e-5, atol=1e-6), (
        out_small, ref_small)
    assert jnp.allclose(out_gen, ref_gen, rtol=1e-5, atol=1e-6), (out_gen, ref_gen)
    assert jnp.allclose(out_wide, ref_wide, rtol=1e-5, atol=1e-6), (
        out_wide, ref_wide)
    # Dense-path results go through the (HIGHEST-precision) MXU segmented
    # reduce; allow a slightly looser tolerance than the pure-VPU paths.
    assert jnp.allclose(out_dense, ref_dense, rtol=1e-4, atol=1e-6), (
        out_dense, ref_dense)
    assert jnp.allclose(out_bf16, ref_bf16, rtol=1e-4, atol=1e-6), (
        out_bf16, ref_bf16)

    print("KERNEL_OK")
</pallas_src>

<mosaic_0001>
module attributes {stable_mosaic.version = 11 : i64} {
  func.func @_l2_row_tile_kernel(%arg0: i32, %arg1: memref<2x32xf32, #tpu.memory_space<vmem>>, %arg2: memref<1x1xf32, #tpu.memory_space<smem>>) attributes {dimension_semantics = [#tpu.dimension_semantics<parallel>], iteration_bounds = array<i64: 1>, scalar_prefetch = 0 : i64, scratch_operands = 0 : i64, tpu.core_type = #tpu.core_type<tc>, window_params = [{transform_indices = @transform_0, window_bounds = array<i64: 2, 32>}, {transform_indices = @transform_1, window_bounds = array<i64: 1, 1>}]} {
    %c0 = arith.constant 0 : index
    %c0_0 = arith.constant 0 : index
    %0 = vector.load %arg1[%c0, %c0_0] : memref<2x32xf32, #tpu.memory_space<vmem>>, vector<2x32xf32>
    %cst = arith.constant 9.99999993E-9 : f32
    %1 = vector.broadcast %cst : f32 to vector<2x32xf32>
    %2 = arith.maximumf %0, %1 : vector<2x32xf32>
    %3 = arith.mulf %2, %2 : vector<2x32xf32>
    %cst_1 = arith.constant dense<0.000000e+00> : vector<2xf32>
    %4 = vector.multi_reduction <add>, %3, %cst_1 [1] : vector<2x32xf32> to vector<2xf32>
    %5 = vector.shape_cast %4 : vector<2xf32> to vector<2x1xf32>
    %6 = math.sqrt %5 : vector<2x1xf32>
    %7 = vector.shape_cast %6 : vector<2x1xf32> to vector<1x2x1xf32>
    %cst_2 = arith.constant dense<0.000000e+00> : vector<1xf32>
    %8 = vector.multi_reduction <add>, %7, %cst_2 [1, 2] : vector<1x2x1xf32> to vector<1xf32>
    %9 = vector.shape_cast %8 : vector<1xf32> to vector<1x1x1xf32>
    %10 = vector.extract %9[0, 0, 0] : f32 from vector<1x1x1xf32>
    %c0_3 = arith.constant 0 : index
    %c0_4 = arith.constant 0 : index
    %11 = memref.load %arg2[%c0_3, %c0_4] : memref<1x1xf32, #tpu.memory_space<smem>>
    memref.store %10, %arg2[%c0_3, %c0_4] : memref<1x1xf32, #tpu.memory_space<smem>>
    return
  }
  func.func @transform_0(%arg0: i32) -> (i32, i32) {
    %c0_i32 = arith.constant 0 : i32
    %c0_i32_0 = arith.constant 0 : i32
    return %arg0, %c0_i32 : i32, i32
  }
  func.func @transform_1(%arg0: i32) -> (i32, i32) {
    %c0_i32 = arith.constant 0 : i32
    %c0_i32_0 = arith.constant 0 : i32
    return %arg0, %c0_i32 : i32, i32
  }
}

</mosaic_0001>

<bundles_post_ra>
// kernel: tpu_custom_call.1
= control target key start
LH: loop header
LB: loop body
LE: loop exit
PB: predicated region body
PF: predicated region fallthrough
CT: control target
= control target key end

     0   :  { %6 = vsyncpa [#allocation3], 0  ;;  %s135_s0 = inlined_call_operand.hbm [shape: f32[2,32], index: 0, kind: input, shape index: {}]   ;;  %s136_s1 = inlined_call_operand.hbm [shape: f32[1,1], index: 1, kind: output, shape index: {}]  }
   0x1   :  { %7 = vsyncpa [#allocation4], 0  ;;  %s13_s8 = sshll.u32 %s135_s0, 4  ;;  %s117_s9 = smov [#allocation2]   ;;  %s14_s8 = int_to_ptr.hbm [resolvable:$true] %s13_s8 }
   0x2   :  { %s15_s10 = sshll.u32 %s117_s9, 4  ;;  %s16_s10 = int_to_ptr.vmem [resolvable:$true] %s15_s10 }
   0x3   :  { %18 = dma.hbm_to_vmem [thread:$0]  %s14_s8, 32, %s16_s10, [#allocation3]  }
   0x4   :  { %113 = dma.done.wait [#allocation3], 32  }
   0x5   :  { %114 = vsyncadd [#allocation3], 4294967264  ;;  %v23_v0 = vld [vmem:[#allocation2] sm:$0x3]  ;;  %vm26_vm0 = vcmask 254976   ;;  %vm42_vm2 = vcmask 1024  }
   0x6   :  { %v24_v1 = vmax.f32 %v23_v0, 1e-08  ;;  %s60_s12 = sshll.u32 %s136_s1, 4  ;;  %s118_s14 = smov [#allocation5]   ;;  %s61_s12 = int_to_ptr.hbm [resolvable:$true] %s60_s12 }
   0x8   :  { %v25_v2 = vmul.f32 %v24_v1, %v24_v1 }
   0xa   :  { %v27_v3 = vsel %vm26_vm0, %v25_v2, 0.0 }
   0xb   :  { %28 = vadd.xlane.f32.xlu0 %v27_v3 }
  0x7e   :  { %v29_v4 = vpop.xlane.xlu0 %28 }
  0x7f   :  { %75 = vrsqrt.f32 %v29_v4  ;;  %vm37_vm1 = vcmp.eq.f32.partialorder %v29_v4, inf  ;;  %v40_v12 = vand.u32 2147483648, %v29_v4  ;;  %vm39_vm3 = vcmp.eq.f32.partialorder %v29_v4, 0.0 }
  0x85   :  { %v76_v5 = vpop.eup %75 }
  0x86   :  { %v31_v6 = vmul.f32 %v76_v5, %v29_v4 }
  0x88   :  { %v32_v7 = vmul.f32 %v76_v5, %v31_v6 }
  0x8a   :  { %v33_v8 = vmul.f32 0.5, %v32_v7 }
  0x8c   :  { %v34_v9 = vsub.f32 1.5, %v33_v8 }
  0x8e   :  { %v35_v10 = vmul.f32 %v76_v5, %v34_v9 }
  0x90   :  { %v36_v11 = vmul.f32 %v35_v10, %v29_v4 }
  0x92   :  { %v38_v13 = vsel %vm37_vm1, %v29_v4, %v36_v11 }
  0x93   :  { %v41_v14 = vsel %vm39_vm3, %v40_v12, %v38_v13 }
  0x94   :  { %v43_v15 = vsel %vm42_vm2, %v41_v14, 0.0 }
  0x95   :  { %44 = vadd.xlane.f32.xlu0 %v43_v15 }
 0x108   :  { %v45_v16 = vpop.xlane.xlu0 %44 }
 0x109   :  { %v46_v17 = vrot.slane %v45_v16, 4 }
 0x10b   :  { %v47_v18 = vadd.f32 %v46_v17, %v45_v16 }
 0x10d   :  { %v48_v19 = vrot.slane %v47_v18, 2 }
 0x10f   :  { %v49_v20 = vadd.f32 %v48_v19, %v47_v18 }
 0x111   :  { %v50_v21 = vrot.slane %v49_v20, 1 }
 0x113   :  { %v51_v22 = vadd.f32 %v50_v21, %v49_v20 }
 0x115   :  { %71 = vpush %v51_v22 }
 0x146   :  { %s72_s13 = spop %71 }
 0x147   :  { %54 = sst [smem:[#allocation5]] %s72_s13 }
 0x148   :  { %63 = dma.smem_to_hbm %s118_s14, 16, %s61_s12, [#allocation4]  }
 0x149   :  { %115 = dma.done.wait [#allocation4], 16  }
 0x14a   :  { %116 = vsyncadd [#allocation4], 4294967280 }
 0x14b   :  { %68 = sfence }
 0x14c   :  { %69 = vsyncpa [#allocation3], 1 }
 0x14d   :  { %70 = vsyncpa [#allocation4], 1 }

</bundles_post_ra>
